<compile_context>
chip_gen: v7x
topology: tpu7x:2x2x1
jax: 0.10.0
libtpu: 0.0.40
codegen_flags: <defaults>
</compile_context>

<pallas_src>
import functools

import jax
import jax.numpy as jnp
from jax import lax
from jax.experimental import pallas as pl
from jax.experimental.pallas import tpu as pltpu

_MIB = 1024 * 1024


def _gap_fc1_kernel(x_ref, w_ref, b_ref, o_ref, acc_ref, *, t_total, t_tile, inv_t):
    """x_ref: (TB, TT, D); w_ref: (O, D); b_ref: (1, O); o_ref: (TB, O); acc_ref: (TB, D) f32."""
    t = pl.program_id(1)
    nt = pl.num_programs(1)

    @pl.when(t == 0)
    def _zero():
        acc_ref[...] = jnp.zeros_like(acc_ref)

    if t_total % t_tile == 0:
        # No partial time tile: single unmasked accumulate on every step.
        acc_ref[...] += jnp.sum(x_ref[...], axis=1, dtype=jnp.float32)
    else:
        # Full tiles: unmasked add. Only the final (partial) tile pays the mask.
        @pl.when(t != nt - 1)
        def _full():
            acc_ref[...] += jnp.sum(x_ref[...], axis=1, dtype=jnp.float32)

        @pl.when(t == nt - 1)
        def _tail():
            x = x_ref[...]
            time_ids = t * t_tile + lax.broadcasted_iota(jnp.int32, x.shape, 1)
            # Select-based masking discards any garbage/NaN in the padded region.
            x = jnp.where(time_ids < t_total, x, jnp.zeros_like(x))
            acc_ref[...] += jnp.sum(x, axis=1, dtype=jnp.float32)

    @pl.when(t == nt - 1)
    def _fc():
        w = w_ref[...]
        if w.dtype != jnp.float32:
            w = w.astype(jnp.float32)
        # pooled_sum (TB, D) x weight (O, D), contracting on D -> (TB, O).
        y = lax.dot_general(
            acc_ref[...], w,
            dimension_numbers=(((1,), (1,)), ((), ())),
            preferred_element_type=jnp.float32,
        )
        # Fold the 1/T mean scale into the tiny (TB, O) result, add bias, cast.
        # NOTE: rows of a partial tail batch block hold garbage here; Pallas drops
        # out-of-bounds output writes, so only valid rows reach HBM.
        o_ref[...] = (y * inv_t + b_ref[...].astype(jnp.float32)).astype(o_ref.dtype)


def _tpu_vmem_capacity_bytes():
    """Physical VMEM per TensorCore; conservative 64 MiB fallback (v7x-sized)."""
    try:
        cap = int(pltpu.get_tpu_info().vmem_capacity_bytes)
        if cap > 0:
            return cap
    except Exception:
        pass
    return 64 * _MIB


def _round_down_8(n):
    return max(8, (n // 8) * 8)


def _working_set_bytes(tb, tt, D, out_num, x_itemsize, w_bytes, out_itemsize):
    x_bytes = 2 * tb * tt * D * x_itemsize                    # double-buffered x tile
    acc_bytes = tb * D * 4                                    # resident f32 accumulator
    out_bytes = 2 * tb * max(out_num, 128) * out_itemsize     # double-buffered output
    bias_bytes = 8 * max(out_num, 128) * 4                    # (1, O) padded to (8, 128k)
    internal = 2 * _MIB                                       # compiler internal scratch
    return x_bytes + acc_bytes + w_bytes + out_bytes + bias_bytes + internal


def _choose_tiles(B, T, D, out_num, x_itemsize, w_bytes, out_itemsize, budget):
    # Time tile: full T when modest (no tail mask at all); else large chunks so the
    # per-grid-step overhead (~0.35us) is amortized against a multi-MiB DMA.
    tt = T if T <= 512 else 512

    # Batch tile: for real batches keep >= 2 batch grid steps so v7x megacore can
    # shard the "parallel" axis across its two TensorCores, and keep the tile
    # sublane-aligned (multiple of 8). Tiny batches use a single batch tile.
    if B >= 16:
        tb = min(_round_down_8((B + 1) // 2), 1024)
        tb_min = 8
    else:
        tb = B
        tb_min = B

    def fits(tb_, tt_):
        return _working_set_bytes(tb_, tt_, D, out_num,
                                  x_itemsize, w_bytes, out_itemsize) <= budget

    while not fits(tb, tt):
        if tb > tb_min:
            tb = max(tb_min, _round_down_8(tb // 2))
        elif tt > 8:
            tt = max(8, _round_down_8(tt // 2))
        else:
            break  # degenerate shape; vmem_limit below still covers the working set
    return tb, tt


def temporal_gap_fc1(x, weight, bias, *, tb=None, tt=None):
    """x: (B, T, D); weight: (out_num, D) (PyTorch Linear layout); bias: (out_num,)."""
    B, T, D = x.shape
    out_num = weight.shape[0]
    b2 = bias.reshape(1, out_num)  # cheap glue, plain JAX

    x_itemsize = jnp.dtype(x.dtype).itemsize
    w_itemsize = jnp.dtype(weight.dtype).itemsize
    out_itemsize = x_itemsize
    w_bytes = 2 * out_num * max(D, 128) * w_itemsize  # count double-buffered (conservative)

    vmem_cap = _tpu_vmem_capacity_bytes()
    # Resident working-set budget: ~5/8 of physical VMEM, capped at 64 MiB
    # (=> ~40 MiB on v7x's 64 MiB/TC; 64 MiB on v5e/v6e's 128 MiB).
    budget = min(vmem_cap * 5 // 8, 64 * _MIB)

    auto_tb, auto_tt = _choose_tiles(B, T, D, out_num, x_itemsize, w_bytes,
                                     out_itemsize, budget)
    TB = min(tb if tb is not None else auto_tb, B)
    TT = min(tt if tt is not None else auto_tt, T)

    grid = (pl.cdiv(B, TB), pl.cdiv(T, TT))

    working = _working_set_bytes(TB, TT, D, out_num, x_itemsize, w_bytes, out_itemsize)
    vmem_limit = int(min(vmem_cap, max(32 * _MIB, working + 16 * _MIB)))

    kernel = functools.partial(_gap_fc1_kernel, t_total=T, t_tile=TT,
                               inv_t=float(1.0 / T))

    cost = pl.CostEstimate(
        flops=2 * B * D * out_num + B * T * D,
        transcendentals=0,
        bytes_accessed=(B * T * D) * x_itemsize
        + out_num * D * w_itemsize
        + out_num * jnp.dtype(bias.dtype).itemsize
        + B * out_num * out_itemsize,
    )

    def build(single_buffer_consts):
        const_kw = {}
        if single_buffer_consts and hasattr(pl, "Buffered"):
            # Constant-index weight/bias: double-buffering buys nothing; halve their VMEM.
            const_kw["pipeline_mode"] = pl.Buffered(1)
        return pl.pallas_call(
            kernel,
            out_shape=jax.ShapeDtypeStruct((B, out_num), x.dtype),
            grid_spec=pltpu.PrefetchScalarGridSpec(
                num_scalar_prefetch=0,
                grid=grid,
                in_specs=[
                    pl.BlockSpec((TB, TT, D), lambda i, t: (i, t, 0)),
                    pl.BlockSpec((out_num, D), lambda i, t: (0, 0), **const_kw),
                    pl.BlockSpec((1, out_num), lambda i, t: (0, 0), **const_kw),
                ],
                out_specs=pl.BlockSpec((TB, out_num), lambda i, t: (i, 0)),
                scratch_shapes=[pltpu.VMEM((TB, D), jnp.float32)],
            ),
            compiler_params=pltpu.CompilerParams(
                dimension_semantics=("parallel", "arbitrary"),
                vmem_limit_bytes=vmem_limit,
            ),
            cost_estimate=cost,
        )

    try:
        return build(True)(x, weight, b2)
    except Exception:
        # pipeline_mode=pl.Buffered(1) unsupported on this jax version: retry with
        # default double-buffering (working-set accounting already covers 2x).
        return build(False)(x, weight, b2)


if __name__ == "__main__":
    # Small shapes consistent with the module:
    #   data_length=[96, 32]  -> D = 128 input features
    #   class_length=[8, 24]  -> out_num = 32 (neither only_scene nor only_action)
    D, out_num = 128, 32
    key = jax.random.PRNGKey(0)
    k1, k2, k3, k4 = jax.random.split(key, 4)

    bound = 1.0 / (D ** 0.5)
    weight = jax.random.uniform(k2, (out_num, D), jnp.float32, -bound, bound)
    bias = jax.random.uniform(k3, (out_num,), jnp.float32, -bound, bound)

    def ref_fn(x, w, b):
        return jnp.mean(x, axis=1) @ w.T + b

    # 1) Default path (exact tiles, no masking): B=2, T=8.
    x1 = jax.random.normal(k1, (2, 8, D), dtype=jnp.float32)
    out1 = jax.block_until_ready(temporal_gap_fc1(x1, weight, bias))
    assert out1.shape == (2, out_num), out1.shape
    assert jnp.allclose(out1, ref_fn(x1, weight, bias), atol=1e-5, rtol=1e-5), \
        float(jnp.max(jnp.abs(out1 - ref_fn(x1, weight, bias))))

    # 2) Partial-tile path (cdiv batch grid + masked tail time tile): B=9, T=20, TB=8, TT=16.
    x2 = jax.random.normal(k4, (9, 20, D), dtype=jnp.float32)
    out2 = jax.block_until_ready(temporal_gap_fc1(x2, weight, bias, tb=8, tt=16))
    assert out2.shape == (9, out_num), out2.shape
    assert jnp.allclose(out2, ref_fn(x2, weight, bias), atol=1e-5, rtol=1e-5), \
        float(jnp.max(jnp.abs(out2 - ref_fn(x2, weight, bias))))

    print("KERNEL_OK")
</pallas_src>

<mosaic_0001>
module attributes {stable_mosaic.version = 11 : i64} {
  func.func @_gap_fc1_kernel(%arg0: i32, %arg1: i32, %arg2: memref<2x8x128xf32, #tpu.memory_space<vmem>>, %arg3: memref<32x128xf32, #tpu.memory_space<vmem>>, %arg4: memref<1x32xf32, #tpu.memory_space<vmem>>, %arg5: memref<2x32xf32, #tpu.memory_space<vmem>>, %arg6: memref<2x128xf32, #tpu.memory_space<vmem>>) attributes {dimension_semantics = [#tpu.dimension_semantics<parallel>, #tpu.dimension_semantics<arbitrary>], iteration_bounds = array<i64: 1, 1>, scalar_prefetch = 0 : i64, scratch_operands = 1 : i64, tpu.core_type = #tpu.core_type<tc>, window_params = [{transform_indices = @transform_0, window_bounds = array<i64: 2, 8, 128>}, {pipeline_mode = #tpu.pipeline_mode<synchronous>, transform_indices = @transform_1, window_bounds = array<i64: 32, 128>}, {pipeline_mode = #tpu.pipeline_mode<synchronous>, transform_indices = @transform_2, window_bounds = array<i64: 1, 32>}, {transform_indices = @transform_3, window_bounds = array<i64: 2, 32>}]} {
    %c0_i32 = arith.constant 0 : i32
    %0 = arith.cmpi eq, %arg1, %c0_i32 : i32
    %1 = arith.extui %0 : i1 to i32
    %c0_i32_0 = arith.constant 0 : i32
    %2 = arith.cmpi ne, %1, %c0_i32_0 : i32
    scf.if %2 {
      %cst_9 = arith.constant 0.000000e+00 : f32
      %11 = vector.broadcast %cst_9 : f32 to vector<2x128xf32>
      %c0_10 = arith.constant 0 : index
      %c0_11 = arith.constant 0 : index
      %12 = vector.load %arg6[%c0_10, %c0_11] : memref<2x128xf32, #tpu.memory_space<vmem>>, vector<2x128xf32>
      tpu.vector_store %arg6[%c0_10, %c0_11], %11 {strides = array<i32>} : memref<2x128xf32, #tpu.memory_space<vmem>>, vector<2x128xf32>,
    } else {
    }
    %c0 = arith.constant 0 : index
    %c0_1 = arith.constant 0 : index
    %3 = vector.load %arg6[%c0, %c0_1] : memref<2x128xf32, #tpu.memory_space<vmem>>, vector<2x128xf32>
    %c0_2 = arith.constant 0 : index
    %c0_3 = arith.constant 0 : index
    %c0_4 = arith.constant 0 : index
    %4 = vector.load %arg2[%c0_2, %c0_3, %c0_4] : memref<2x8x128xf32, #tpu.memory_space<vmem>>, vector<2x8x128xf32>
    %cst = arith.constant dense<0.000000e+00> : vector<2x128xf32>
    %5 = vector.multi_reduction <add>, %4, %cst [1] : vector<2x8x128xf32> to vector<2x128xf32>
    %6 = arith.addf %3, %5 : vector<2x128xf32>
    %c0_5 = arith.constant 0 : index
    %c0_6 = arith.constant 0 : index
    %7 = vector.load %arg6[%c0_5, %c0_6] : memref<2x128xf32, #tpu.memory_space<vmem>>, vector<2x128xf32>
    tpu.vector_store %arg6[%c0_5, %c0_6], %6 {strides = array<i32>} : memref<2x128xf32, #tpu.memory_space<vmem>>, vector<2x128xf32>,
    %c0_i32_7 = arith.constant 0 : i32
    %8 = arith.cmpi eq, %arg1, %c0_i32_7 : i32
    %9 = arith.extui %8 : i1 to i32
    %c0_i32_8 = arith.constant 0 : i32
    %10 = arith.cmpi ne, %9, %c0_i32_8 : i32
    scf.if %10 {
      %c0_9 = arith.constant 0 : index
      %c0_10 = arith.constant 0 : index
      %11 = vector.load %arg3[%c0_9, %c0_10] : memref<32x128xf32, #tpu.memory_space<vmem>>, vector<32x128xf32>
      %c0_11 = arith.constant 0 : index
      %c0_12 = arith.constant 0 : index
      %12 = vector.load %arg6[%c0_11, %c0_12] : memref<2x128xf32, #tpu.memory_space<vmem>>, vector<2x128xf32>
      %cst_13 = arith.constant dense<0.000000e+00> : vector<2x32xf32>
      %13 = tpu.matmul %12, %11, %cst_13 {dimension_numbers = #tpu.dot_dimension_numbers<[1], [1], [0], [0], [0, 0, 1, 0], [], []>} : vector<2x128xf32>, vector<32x128xf32>, vector<2x32xf32> -> vector<2x32xf32>
      %cst_14 = arith.constant 1.250000e-01 : f32
      %14 = vector.broadcast %cst_14 : f32 to vector<2x32xf32>
      %15 = arith.mulf %13, %14 : vector<2x32xf32>
      %c0_15 = arith.constant 0 : index
      %c0_16 = arith.constant 0 : index
      %16 = vector.load %arg4[%c0_15, %c0_16] : memref<1x32xf32, #tpu.memory_space<vmem>>, vector<1x32xf32>
      %17 = vector.broadcast %16 : vector<1x32xf32> to vector<2x32xf32>
      %18 = arith.addf %15, %17 : vector<2x32xf32>
      %c0_17 = arith.constant 0 : index
      %c0_18 = arith.constant 0 : index
      %19 = vector.load %arg5[%c0_17, %c0_18] : memref<2x32xf32, #tpu.memory_space<vmem>>, vector<2x32xf32>
      tpu.vector_store %arg5[%c0_17, %c0_18], %18 {strides = array<i32>} : memref<2x32xf32, #tpu.memory_space<vmem>>, vector<2x32xf32>,
    } else {
    }
    return
  }
  func.func @transform_0(%arg0: i32, %arg1: i32) -> (i32, i32, i32) {
    %c0_i32 = arith.constant 0 : i32
    %c0_i32_0 = arith.constant 0 : i32
    return %arg0, %arg1, %c0_i32 : i32, i32, i32
  }
  func.func @transform_1(%arg0: i32, %arg1: i32) -> (i32, i32) {
    %c0_i32 = arith.constant 0 : i32
    %c0_i32_0 = arith.constant 0 : i32
    %c0_i32_1 = arith.constant 0 : i32
    return %c0_i32, %c0_i32_0 : i32, i32
  }
  func.func @transform_2(%arg0: i32, %arg1: i32) -> (i32, i32) {
    %c0_i32 = arith.constant 0 : i32
    %c0_i32_0 = arith.constant 0 : i32
    %c0_i32_1 = arith.constant 0 : i32
    return %c0_i32, %c0_i32_0 : i32, i32
  }
  func.func @transform_3(%arg0: i32, %arg1: i32) -> (i32, i32) {
    %c0_i32 = arith.constant 0 : i32
    %c0_i32_0 = arith.constant 0 : i32
    return %arg0, %c0_i32 : i32, i32
  }
}

module attributes {stable_mosaic.version = 11 : i64} {
  func.func @_gap_fc1_kernel(%arg0: i32, %arg1: i32, %arg2: memref<2x8x128xf32, #tpu.memory_space<vmem>>, %arg3: memref<32x128xf32, #tpu.memory_space<vmem>>, %arg4: memref<1x32xf32, #tpu.memory_space<vmem>>, %arg5: memref<2x32xf32, #tpu.memory_space<vmem>>, %arg6: memref<2x128xf32, #tpu.memory_space<vmem>>) attributes {dimension_semantics = [#tpu.dimension_semantics<parallel>, #tpu.dimension_semantics<arbitrary>], iteration_bounds = array<i64: 1, 1>, scalar_prefetch = 0 : i64, scratch_operands = 1 : i64, tpu.core_type = #tpu.core_type<tc>, window_params = [{transform_indices = @transform_0, window_bounds = array<i64: 2, 8, 128>}, {pipeline_mode = #tpu.pipeline_mode<synchronous>, transform_indices = @transform_1, window_bounds = array<i64: 32, 128>}, {pipeline_mode = #tpu.pipeline_mode<synchronous>, transform_indices = @transform_2, window_bounds = array<i64: 1, 32>}, {transform_indices = @transform_3, window_bounds = array<i64: 2, 32>}]} {
    %c0_i32 = arith.constant 0 : i32
    %0 = arith.cmpi eq, %arg1, %c0_i32 : i32
    %1 = arith.extui %0 : i1 to i32
    %c0_i32_0 = arith.constant 0 : i32
    %2 = arith.cmpi ne, %1, %c0_i32_0 : i32
    scf.if %2 {
      %cst_9 = arith.constant 0.000000e+00 : f32
      %11 = vector.broadcast %cst_9 : f32 to vector<2x128xf32>
      %c0_10 = arith.constant 0 : index
      %c0_11 = arith.constant 0 : index
      %12 = vector.load %arg6[%c0_10, %c0_11] : memref<2x128xf32, #tpu.memory_space<vmem>>, vector<2x128xf32>
      tpu.vector_store %arg6[%c0_10, %c0_11], %11 {strides = array<i32>} : memref<2x128xf32, #tpu.memory_space<vmem>>, vector<2x128xf32>,
    } else {
    }
    %c0 = arith.constant 0 : index
    %c0_1 = arith.constant 0 : index
    %3 = vector.load %arg6[%c0, %c0_1] : memref<2x128xf32, #tpu.memory_space<vmem>>, vector<2x128xf32>
    %c0_2 = arith.constant 0 : index
    %c0_3 = arith.constant 0 : index
    %c0_4 = arith.constant 0 : index
    %4 = vector.load %arg2[%c0_2, %c0_3, %c0_4] : memref<2x8x128xf32, #tpu.memory_space<vmem>>, vector<2x8x128xf32>
    %cst = arith.constant dense<0.000000e+00> : vector<2x128xf32>
    %5 = vector.multi_reduction <add>, %4, %cst [1] : vector<2x8x128xf32> to vector<2x128xf32>
    %6 = arith.addf %3, %5 : vector<2x128xf32>
    %c0_5 = arith.constant 0 : index
    %c0_6 = arith.constant 0 : index
    %7 = vector.load %arg6[%c0_5, %c0_6] : memref<2x128xf32, #tpu.memory_space<vmem>>, vector<2x128xf32>
    tpu.vector_store %arg6[%c0_5, %c0_6], %6 {strides = array<i32>} : memref<2x128xf32, #tpu.memory_space<vmem>>, vector<2x128xf32>,
    %c0_i32_7 = arith.constant 0 : i32
    %8 = arith.cmpi eq, %arg1, %c0_i32_7 : i32
    %9 = arith.extui %8 : i1 to i32
    %c0_i32_8 = arith.constant 0 : i32
    %10 = arith.cmpi ne, %9, %c0_i32_8 : i32
    scf.if %10 {
      %c0_9 = arith.constant 0 : index
      %c0_10 = arith.constant 0 : index
      %11 = vector.load %arg3[%c0_9, %c0_10] : memref<32x128xf32, #tpu.memory_space<vmem>>, vector<32x128xf32>
      %c0_11 = arith.constant 0 : index
      %c0_12 = arith.constant 0 : index
      %12 = vector.load %arg6[%c0_11, %c0_12] : memref<2x128xf32, #tpu.memory_space<vmem>>, vector<2x128xf32>
      %cst_13 = arith.constant dense<0.000000e+00> : vector<2x32xf32>
      %13 = tpu.matmul %12, %11, %cst_13 {dimension_numbers = #tpu.dot_dimension_numbers<[1], [1], [0], [0], [0, 0, 1, 0], [], []>} : vector<2x128xf32>, vector<32x128xf32>, vector<2x32xf32> -> vector<2x32xf32>
      %cst_14 = arith.constant 1.250000e-01 : f32
      %14 = vector.broadcast %cst_14 : f32 to vector<2x32xf32>
      %15 = arith.mulf %13, %14 : vector<2x32xf32>
      %c0_15 = arith.constant 0 : index
      %c0_16 = arith.constant 0 : index
      %16 = vector.load %arg4[%c0_15, %c0_16] : memref<1x32xf32, #tpu.memory_space<vmem>>, vector<1x32xf32>
      %17 = vector.broadcast %16 : vector<1x32xf32> to vector<2x32xf32>
      %18 = arith.addf %15, %17 : vector<2x32xf32>
      %c0_17 = arith.constant 0 : index
      %c0_18 = arith.constant 0 : index
      %19 = vector.load %arg5[%c0_17, %c0_18] : memref<2x32xf32, #tpu.memory_space<vmem>>, vector<2x32xf32>
      tpu.vector_store %arg5[%c0_17, %c0_18], %18 {strides = array<i32>} : memref<2x32xf32, #tpu.memory_space<vmem>>, vector<2x32xf32>,
    } else {
    }
    return
  }
  func.func @transform_0(%arg0: i32, %arg1: i32) -> (i32, i32, i32) {
    %c0_i32 = arith.constant 0 : i32
    %c0_i32_0 = arith.constant 0 : i32
    return %arg0, %arg1, %c0_i32 : i32, i32, i32
  }
  func.func @transform_1(%arg0: i32, %arg1: i32) -> (i32, i32) {
    %c0_i32 = arith.constant 0 : i32
    %c0_i32_0 = arith.constant 0 : i32
    %c0_i32_1 = arith.constant 0 : i32
    return %c0_i32, %c0_i32_0 : i32, i32
  }
  func.func @transform_2(%arg0: i32, %arg1: i32) -> (i32, i32) {
    %c0_i32 = arith.constant 0 : i32
    %c0_i32_0 = arith.constant 0 : i32
    %c0_i32_1 = arith.constant 0 : i32
    return %c0_i32, %c0_i32_0 : i32, i32
  }
  func.func @transform_3(%arg0: i32, %arg1: i32) -> (i32, i32) {
    %c0_i32 = arith.constant 0 : i32
    %c0_i32_0 = arith.constant 0 : i32
    return %arg0, %c0_i32 : i32, i32
  }
}

</mosaic_0001>

<bundles_post_ra>
// kernel: tpu_custom_call.1
= control target key start
LH: loop header
LB: loop body
LE: loop exit
PB: predicated region body
PF: predicated region fallthrough
CT: control target
= control target key end

     0   :  { %8 = vsyncpa [#allocation4], 0  ;;  %s345_s0 = inlined_call_operand.hbm [shape: f32[2,8,128], index: 0, kind: input, shape index: {}]   ;;  %s346_s1 = inlined_call_operand.hbm [shape: f32[32,128], index: 1, kind: input, shape index: {}]   ;;  %s347_s2 = inlined_call_operand.vmem [shape: f32[1,32], index: 2, kind: input, shape index: {}]   ;;  %s348_s3 = inlined_call_operand.hbm [shape: f32[2,32], index: 3, kind: output, shape index: {}]  }
   0x1   :  { %9 = vsyncpa [#allocation7], 0 }
   0x2   :  { %10 = vsyncpa [#allocation5], 0  ;;  %s278_s12 = smov [#allocation3]   ;;  %s206_s16 = scalar_lea.hbm %s345_s0, 256 }
   0x3   :  { %s16_s13 = sshll.u32 %s278_s12, 4  ;;  %p207_p0 = scmp.ne.s32.totalorder %s345_s0, %s206_s16  ;;  %s17_s13 = int_to_ptr.vmem [resolvable:$true] %s16_s13 }
   0x4   :  { %p210_p1 = scmp.lt.u32.totalorder %s206_s16, %s345_s0 }
   0x6   :  { %p212_p2 = pnand %p210_p1, %p207_p0 }
   0x8   :  { %215 = shalt.err (!%p212_p2)
}
   0x9   :  { %s216_s21 = scalar_lea.vmem %s17_s13, 256  ;;  %p221_p4 = scmp.lt.s32.totalorder %s17_s13, %s17_s13 }
   0xa   :  { %p217_p3 = scmp.ne.s32.totalorder %s17_s13, %s216_s21  ;;  %p222_p5 = scmp.lt.s32.totalorder %s216_s21, %s216_s21 }
   0xc   :  { %p223_p6 = por %p222_p5, %p221_p4 }
   0xe   :  { %p224_p7 = pnand %p223_p6, %p217_p3 }
  0x10   :  { %227 = shalt.err (!%p224_p7)
}
  0x11   :  { %s279_s22 = smov 128   ;;  %s280_s23 = smov 8  }
  0x12   :  { %22 = dma.hbm_to_vmem [thread:$0]  %s345_s0, 256, %s17_s13, [#allocation4], %s279_s22, %s279_s22, %s280_s23  }
  0x13   :  { %s281_s26 = smov [#allocation6]   ;;  %s228_s30 = scalar_lea.hbm %s346_s1, 512 }
  0x14   :  { %s28_s27 = sshll.u32 %s281_s26, 4  ;;  %p229_p8 = scmp.ne.s32.totalorder %s346_s1, %s228_s30  ;;  %s29_s27 = int_to_ptr.vmem [resolvable:$true] %s28_s27 }
  0x15   :  { %p232_p9 = scmp.lt.u32.totalorder %s228_s30, %s346_s1 }
  0x17   :  { %p234_p10 = pnand %p232_p9, %p229_p8 }
  0x19   :  { %237 = shalt.err (!%p234_p10)
}
  0x1a   :  { %s238_s8 = scalar_lea.vmem %s29_s27, 512  ;;  %p243_p12 = scmp.lt.s32.totalorder %s29_s27, %s29_s27 }
  0x1b   :  { %p239_p11 = scmp.ne.s32.totalorder %s29_s27, %s238_s8  ;;  %p244_p13 = scmp.lt.s32.totalorder %s238_s8, %s238_s8 }
  0x1d   :  { %p245_p0 = por %p244_p13, %p243_p12 }
  0x1f   :  { %p246_p1 = pnand %p245_p0, %p239_p11 }
  0x21   :  { %249 = shalt.err (!%p246_p1)
}
  0x22   :  { %34 = dma.hbm_to_vmem [thread:$0]  %s346_s1, 512, %s29_s27, [#allocation7], %s279_s22, %s279_s22, %s280_s23  }
  0x23   :  { %272 = dma.done.wait [#allocation4], 256  }
  0x24   :  { %273 = vsyncadd [#allocation4], 4294967040 }
  0x25   :  { %274 = dma.done.wait [#allocation7], 512  }
  0x26   :  { %275 = vsyncadd [#allocation7], 4294966784  ;;  %v282_v0 = vmov 0.0|0.0   ;;  %v283_v1 = vmov 0.0   ;;  %vm284_vm0 = vmmov 0   ;;  %v73_v2 = vld [vmem:[#allocation6] sm:$0xff] }
  0x27   :  { %192 = vmatprep.subr.bf16.mxu0 %v282_v0  ;;  %47 = vst [vmem:[#allocation2] sm:$0x3] %v283_v1  ;;  %189 = vmatprep.mubr.msk.f32.mxu0 %vm284_vm0, %v283_v1  ;;  %v74_v3 = vld [vmem:[#allocation6 + $0x8] sm:$0xff]  ;;  %v49_v5 = vld [vmem:[#allocation3] sm:$0xff]  ;;  %v50_v6 = vld [vmem:[#allocation3 + $0x8] sm:$0xff]  ;;  %vm65_vm1 = vcmask 1041409  }
  0x28   :  { %v193_v4 = vpack.c.bf16 %v74_v3, %v73_v2  ;;  %v51_v7 = vrot.slane %v49_v5, 4  ;;  %v57_v8 = vrot.slane %v50_v6, 4  ;;  %v75_v9 = vld [vmem:[#allocation6 + $0x10] sm:$0xff]  ;;  %v76_v10 = vld [vmem:[#allocation6 + $0x18] sm:$0xff]  ;;  %v175_v27 = vld [vmem:[%s347_s2] ss:$0 sm:$0xff] }
  0x29   :  { %v196_v14 = vpack.c.bf16 %v76_v10, %v75_v9  ;;  %s285_s11 = smov [#allocation8]   ;;  %vm157_vm2 = vcmask 254976  }
  0x2a   :  { %194 = vmatpush3.bf16.xpose.msra.mxu0 %v193_v4  ;;  %v52_v11 = vadd.f32 %v51_v7, %v49_v5  ;;  %v58_v12 = vadd.f32 %v57_v8, %v50_v6  ;;  %s165_s12 = sshll.u32 %s285_s11, 4  ;;  %s166_s12 = int_to_ptr.vmem [resolvable:$true] %s165_s12 }
  0x2b   :  { %195 = vmatprep.subr.bf16.mxu0 %v282_v0  ;;  %s250_s13 = scalar_lea.vmem %s166_s12, 32  ;;  %p255_p3 = scmp.lt.s32.totalorder %s166_s12, %s166_s12 }
  0x2c   :  { %v53_v13 = vrot.slane %v52_v11, 2  ;;  %v59_v15 = vrot.slane %v58_v12, 2  ;;  %p251_p2 = scmp.ne.s32.totalorder %s166_s12, %s250_s13  ;;  %p256_p4 = scmp.lt.s32.totalorder %s250_s13, %s250_s13 }
  0x2e   :  { %v54_v16 = vadd.f32 %v53_v13, %v52_v11  ;;  %v60_v17 = vadd.f32 %v59_v15, %v58_v12  ;;  %v48_v21 = vld [vmem:[#allocation2] sm:$0x3]  ;;  %p257_p5 = por %p256_p4, %p255_p3 }
  0x30   :  { %v55_v18 = vrot.slane %v54_v16, 1  ;;  %v61_v19 = vrot.slane %v60_v17, 1  ;;  %p258_p6 = pnand %p257_p5, %p251_p2 }
  0x32   :  { %197 = vmatpush3.bf16.xpose.msra.mxu0 %v196_v14  ;;  %v56_v20 = vadd.f32 %v55_v18, %v54_v16  ;;  %v62_v22 = vadd.f32 %v61_v19, %v60_v17 }
  0x34   :  { %v66_v23 = vsel %vm65_vm1, %v62_v22, %v56_v20 }
  0x35   :  { %v68_v24 = vadd.f32 %v66_v23, %v48_v21 }
  0x37   :  { %69 = vst [vmem:[#allocation2] sm:$0x3] %v68_v24 }
  0x3e   :  { %v77_v25 = vld [vmem:[#allocation2] sm:$0x3] }
  0x3f   :  { %190 = vmatmul.mubr.f32.vlgmr.msra.gmra.mrb[0].mxu0 %v77_v25 }
 0x112   :  { %v144_v26 = vpop.f32.mrb[0].mxu0 }
 0x113   :  { %v148_v28 = vmul.f32 0.125, %v144_v26  ;;  %v191_v29 = vpop.f32.mrb[1].mxu0 }
 0x115   :  { %v156_v30 = vadd.f32 %v175_v27, %v148_v28 }
 0x117   :  { %158 = vst.msk [vmem:[#allocation8] sm:$0x3] %vm157_vm2, %v156_v30 }
 0x118   :  { %261 = shalt.err (!%p258_p6)
}
 0x119   :  { %s262_s16 = scalar_lea.hbm %s348_s3, 32 }
 0x11a   :  { %p263_p7 = scmp.ne.s32.totalorder %s348_s3, %s262_s16  ;;  %p266_p8 = scmp.lt.u32.totalorder %s262_s16, %s348_s3 }
 0x11c   :  { %p268_p9 = pnand %p266_p8, %p263_p7 }
 0x11e   :  { %271 = shalt.err (!%p268_p9)
}
 0x11f   :  { %168 = dma.vmem_to_hbm [thread:$0]  %s166_s12, 32, %s348_s3, [#allocation5]  }
 0x120   :  { %276 = dma.done.wait [#allocation5], 32  }
 0x121   :  { %277 = vsyncadd [#allocation5], 4294967264 }
 0x122   :  { %172 = vsyncpa [#allocation4], 1 }
 0x123   :  { %173 = vsyncpa [#allocation7], 1 }
 0x124   :  { %174 = vsyncpa [#allocation5], 1 }

// kernel: tpu_custom_call.1
= control target key start
LH: loop header
LB: loop body
LE: loop exit
PB: predicated region body
PF: predicated region fallthrough
CT: control target
= control target key end

     0   :  { %8 = vsyncpa [#allocation4], 0  ;;  %s345_s0 = inlined_call_operand.hbm [shape: f32[2,8,128], index: 0, kind: input, shape index: {}]   ;;  %s346_s1 = inlined_call_operand.hbm [shape: f32[32,128], index: 1, kind: input, shape index: {}]   ;;  %s347_s2 = inlined_call_operand.vmem [shape: f32[1,32], index: 2, kind: input, shape index: {}]   ;;  %s348_s3 = inlined_call_operand.hbm [shape: f32[2,32], index: 3, kind: output, shape index: {}]  }
   0x1   :  { %9 = vsyncpa [#allocation7], 0 }
   0x2   :  { %10 = vsyncpa [#allocation5], 0  ;;  %s278_s12 = smov [#allocation3]   ;;  %s206_s16 = scalar_lea.hbm %s345_s0, 256 }
   0x3   :  { %s16_s13 = sshll.u32 %s278_s12, 4  ;;  %p207_p0 = scmp.ne.s32.totalorder %s345_s0, %s206_s16  ;;  %s17_s13 = int_to_ptr.vmem [resolvable:$true] %s16_s13 }
   0x4   :  { %p210_p1 = scmp.lt.u32.totalorder %s206_s16, %s345_s0 }
   0x6   :  { %p212_p2 = pnand %p210_p1, %p207_p0 }
   0x8   :  { %215 = shalt.err (!%p212_p2)
}
   0x9   :  { %s216_s21 = scalar_lea.vmem %s17_s13, 256  ;;  %p221_p4 = scmp.lt.s32.totalorder %s17_s13, %s17_s13 }
   0xa   :  { %p217_p3 = scmp.ne.s32.totalorder %s17_s13, %s216_s21  ;;  %p222_p5 = scmp.lt.s32.totalorder %s216_s21, %s216_s21 }
   0xc   :  { %p223_p6 = por %p222_p5, %p221_p4 }
   0xe   :  { %p224_p7 = pnand %p223_p6, %p217_p3 }
  0x10   :  { %227 = shalt.err (!%p224_p7)
}
  0x11   :  { %s279_s22 = smov 128   ;;  %s280_s23 = smov 8  }
  0x12   :  { %22 = dma.hbm_to_vmem [thread:$0]  %s345_s0, 256, %s17_s13, [#allocation4], %s279_s22, %s279_s22, %s280_s23  }
  0x13   :  { %s281_s26 = smov [#allocation6]   ;;  %s228_s30 = scalar_lea.hbm %s346_s1, 512 }
  0x14   :  { %s28_s27 = sshll.u32 %s281_s26, 4  ;;  %p229_p8 = scmp.ne.s32.totalorder %s346_s1, %s228_s30  ;;  %s29_s27 = int_to_ptr.vmem [resolvable:$true] %s28_s27 }
  0x15   :  { %p232_p9 = scmp.lt.u32.totalorder %s228_s30, %s346_s1 }
  0x17   :  { %p234_p10 = pnand %p232_p9, %p229_p8 }
  0x19   :  { %237 = shalt.err (!%p234_p10)
}
  0x1a   :  { %s238_s8 = scalar_lea.vmem %s29_s27, 512  ;;  %p243_p12 = scmp.lt.s32.totalorder %s29_s27, %s29_s27 }
  0x1b   :  { %p239_p11 = scmp.ne.s32.totalorder %s29_s27, %s238_s8  ;;  %p244_p13 = scmp.lt.s32.totalorder %s238_s8, %s238_s8 }
  0x1d   :  { %p245_p0 = por %p244_p13, %p243_p12 }
  0x1f   :  { %p246_p1 = pnand %p245_p0, %p239_p11 }
  0x21   :  { %249 = shalt.err (!%p246_p1)
}
  0x22   :  { %34 = dma.hbm_to_vmem [thread:$0]  %s346_s1, 512, %s29_s27, [#allocation7], %s279_s22, %s279_s22, %s280_s23  }
  0x23   :  { %272 = dma.done.wait [#allocation4], 256  }
  0x24   :  { %273 = vsyncadd [#allocation4], 4294967040 }
  0x25   :  { %274 = dma.done.wait [#allocation7], 512  }
  0x26   :  { %275 = vsyncadd [#allocation7], 4294966784  ;;  %v282_v0 = vmov 0.0|0.0   ;;  %v283_v1 = vmov 0.0   ;;  %vm284_vm0 = vmmov 0   ;;  %v73_v2 = vld [vmem:[#allocation6] sm:$0xff] }
  0x27   :  { %192 = vmatprep.subr.bf16.mxu0 %v282_v0  ;;  %47 = vst [vmem:[#allocation2] sm:$0x3] %v283_v1  ;;  %189 = vmatprep.mubr.msk.f32.mxu0 %vm284_vm0, %v283_v1  ;;  %v74_v3 = vld [vmem:[#allocation6 + $0x8] sm:$0xff]  ;;  %v49_v5 = vld [vmem:[#allocation3] sm:$0xff]  ;;  %v50_v6 = vld [vmem:[#allocation3 + $0x8] sm:$0xff]  ;;  %vm65_vm1 = vcmask 1041409  }
  0x28   :  { %v193_v4 = vpack.c.bf16 %v74_v3, %v73_v2  ;;  %v51_v7 = vrot.slane %v49_v5, 4  ;;  %v57_v8 = vrot.slane %v50_v6, 4  ;;  %v75_v9 = vld [vmem:[#allocation6 + $0x10] sm:$0xff]  ;;  %v76_v10 = vld [vmem:[#allocation6 + $0x18] sm:$0xff]  ;;  %v175_v27 = vld [vmem:[%s347_s2] ss:$0 sm:$0xff] }
  0x29   :  { %v196_v14 = vpack.c.bf16 %v76_v10, %v75_v9  ;;  %s285_s11 = smov [#allocation8]   ;;  %vm157_vm2 = vcmask 254976  }
  0x2a   :  { %194 = vmatpush3.bf16.xpose.msra.mxu0 %v193_v4  ;;  %v52_v11 = vadd.f32 %v51_v7, %v49_v5  ;;  %v58_v12 = vadd.f32 %v57_v8, %v50_v6  ;;  %s165_s12 = sshll.u32 %s285_s11, 4  ;;  %s166_s12 = int_to_ptr.vmem [resolvable:$true] %s165_s12 }
  0x2b   :  { %195 = vmatprep.subr.bf16.mxu0 %v282_v0  ;;  %s250_s13 = scalar_lea.vmem %s166_s12, 32  ;;  %p255_p3 = scmp.lt.s32.totalorder %s166_s12, %s166_s12 }
  0x2c   :  { %v53_v13 = vrot.slane %v52_v11, 2  ;;  %v59_v15 = vrot.slane %v58_v12, 2  ;;  %p251_p2 = scmp.ne.s32.totalorder %s166_s12, %s250_s13  ;;  %p256_p4 = scmp.lt.s32.totalorder %s250_s13, %s250_s13 }
  0x2e   :  { %v54_v16 = vadd.f32 %v53_v13, %v52_v11  ;;  %v60_v17 = vadd.f32 %v59_v15, %v58_v12  ;;  %v48_v21 = vld [vmem:[#allocation2] sm:$0x3]  ;;  %p257_p5 = por %p256_p4, %p255_p3 }
  0x30   :  { %v55_v18 = vrot.slane %v54_v16, 1  ;;  %v61_v19 = vrot.slane %v60_v17, 1  ;;  %p258_p6 = pnand %p257_p5, %p251_p2 }
  0x32   :  { %197 = vmatpush3.bf16.xpose.msra.mxu0 %v196_v14  ;;  %v56_v20 = vadd.f32 %v55_v18, %v54_v16  ;;  %v62_v22 = vadd.f32 %v61_v19, %v60_v17 }
  0x34   :  { %v66_v23 = vsel %vm65_vm1, %v62_v22, %v56_v20 }
  0x35   :  { %v68_v24 = vadd.f32 %v66_v23, %v48_v21 }
  0x37   :  { %69 = vst [vmem:[#allocation2] sm:$0x3] %v68_v24 }
  0x3e   :  { %v77_v25 = vld [vmem:[#allocation2] sm:$0x3] }
  0x3f   :  { %190 = vmatmul.mubr.f32.vlgmr.msra.gmra.mrb[0].mxu0 %v77_v25 }
 0x112   :  { %v144_v26 = vpop.f32.mrb[0].mxu0 }
 0x113   :  { %v148_v28 = vmul.f32 0.125, %v144_v26  ;;  %v191_v29 = vpop.f32.mrb[1].mxu0 }
 0x115   :  { %v156_v30 = vadd.f32 %v175_v27, %v148_v28 }
 0x117   :  { %158 = vst.msk [vmem:[#allocation8] sm:$0x3] %vm157_vm2, %v156_v30 }
 0x118   :  { %261 = shalt.err (!%p258_p6)
}
 0x119   :  { %s262_s16 = scalar_lea.hbm %s348_s3, 32 }
 0x11a   :  { %p263_p7 = scmp.ne.s32.totalorder %s348_s3, %s262_s16  ;;  %p266_p8 = scmp.lt.u32.totalorder %s262_s16, %s348_s3 }
 0x11c   :  { %p268_p9 = pnand %p266_p8, %p263_p7 }
 0x11e   :  { %271 = shalt.err (!%p268_p9)
}
 0x11f   :  { %168 = dma.vmem_to_hbm [thread:$0]  %s166_s12, 32, %s348_s3, [#allocation5]  }
 0x120   :  { %276 = dma.done.wait [#allocation5], 32  }
 0x121   :  { %277 = vsyncadd [#allocation5], 4294967264 }
 0x122   :  { %172 = vsyncpa [#allocation4], 1 }
 0x123   :  { %173 = vsyncpa [#allocation7], 1 }
 0x124   :  { %174 = vsyncpa [#allocation5], 1 }

</bundles_post_ra>
